<compile_context>
chip_gen: v5e
topology: v5e:2x2
jax: 0.10.0
libtpu: 0.0.40
codegen_flags: <defaults>
</compile_context>

<pallas_src>
import functools

import jax
import jax.numpy as jnp
from jax.experimental import pallas as pl
from jax.experimental.pallas import tpu as pltpu


def _round_up(x, m):
    return (x + m - 1) // m * m


def _pick(dim, candidates):
    """Largest candidate that evenly divides `dim`, else the full dim
    (full-extent blocks are always legal w.r.t. the (8,128) constraint)."""
    for t in candidates:
        if t <= dim and dim % t == 0:
            return t
    return dim


# ----------------------------------------------------------------------------
# Whole-MLP fused kernel: grid over M tiles only; all weights VMEM-resident.
# ----------------------------------------------------------------------------
def _mlp_fused_kernel(gains_ref, shifts_ref, x_ref, *refs, n_layer):
    o_ref = refs[-1]
    wb = refs[:-1]           # (w0, b0, w1, b1, ..., w_last, b_last)

    # Layer 0: plain Linear (identity Affine skipped statically).
    h = (jnp.dot(x_ref[...], wb[0][...], preferred_element_type=jnp.float32)
         + wb[1][...].astype(jnp.float32))

    # Hidden blocks: Affine (scalar gain/shift from SMEM) -> Linear -> Tanh.
    # `h` never leaves VMEM between layers.
    for n in range(n_layer):
        w_ref, b_ref = wb[2 + 2 * n], wb[3 + 2 * n]
        a = h * gains_ref[n] + shifts_ref[n]
        h = jnp.tanh(
            jnp.dot(a.astype(w_ref.dtype), w_ref[...],
                    preferred_element_type=jnp.float32)
            + b_ref[...].astype(jnp.float32))

    # Final Linear into a lane-dense (>=128-wide) output slab.
    y = (jnp.dot(h.astype(wb[-2].dtype), wb[-2][...],
                 preferred_element_type=jnp.float32)
         + wb[-1][...].astype(jnp.float32))
    o_ref[...] = y.astype(o_ref.dtype)


def _mlp_fused_call(x, mats, gains, shifts, *, tm, n_layer):
    m_pad, k0 = x.shape
    out_pad = mats[-1][0].shape[1]

    wb_arrays = []
    in_specs = [
        pl.BlockSpec(memory_space=pltpu.MemorySpace.SMEM),  # gains  (n_layer,)
        pl.BlockSpec(memory_space=pltpu.MemorySpace.SMEM),  # shifts (n_layer,)
        pl.BlockSpec((tm, k0), lambda i: (i, 0)),            # activations tile
    ]
    for w, b in mats:
        b2d = b.reshape(1, -1)
        wb_arrays += [w, b2d]
        # Constant block index -> each weight/bias is DMA'd from HBM exactly once
        # and stays resident in VMEM across all M tiles.
        in_specs.append(pl.BlockSpec(w.shape, lambda i: (0, 0)))
        in_specs.append(pl.BlockSpec(b2d.shape, lambda i: (0, 0)))

    kernel = functools.partial(_mlp_fused_kernel, n_layer=n_layer)
    return pl.pallas_call(
        kernel,
        out_shape=jax.ShapeDtypeStruct((m_pad, out_pad), x.dtype),
        grid_spec=pltpu.PrefetchScalarGridSpec(
            num_scalar_prefetch=0,
            grid=(m_pad // tm,),
            in_specs=in_specs,
            out_specs=pl.BlockSpec((tm, out_pad), lambda i: (i, 0)),
        ),
        compiler_params=pltpu.CompilerParams(
            dimension_semantics=("parallel",)),
    )(gains, shifts, x, *wb_arrays)


# ----------------------------------------------------------------------------
# Per-layer fused fallback (only used when weights do not fit in VMEM).
# ----------------------------------------------------------------------------
def _layer_kernel(gain_ref, shift_ref, x_ref, w_ref, b_ref, o_ref, *scratch,
                  apply_affine, apply_tanh):
    a = x_ref[...]
    if apply_affine:
        a = a * gain_ref[0] + shift_ref[0]
    part = jnp.dot(a, w_ref[...], preferred_element_type=jnp.float32)

    if not scratch:
        # K fits in a single tile: no accumulator scratch, no extra VMEM passes.
        y = part + b_ref[...].astype(jnp.float32)
        if apply_tanh:
            y = jnp.tanh(y)
        o_ref[...] = y.astype(o_ref.dtype)
    else:
        acc_ref = scratch[0]
        k = pl.program_id(2)

        @pl.when(k == 0)
        def _():
            acc_ref[...] = jnp.zeros_like(acc_ref)

        acc_ref[...] += part

        @pl.when(k == pl.num_programs(2) - 1)
        def _():
            y = acc_ref[...] + b_ref[...].astype(jnp.float32)
            if apply_tanh:
                y = jnp.tanh(y)
            o_ref[...] = y.astype(o_ref.dtype)


def _fused_affine_linear(x, w, b, gain, shift, *, apply_affine, apply_tanh, tm):
    m_pad, K = x.shape
    Kw, N = w.shape
    assert K == Kw and m_pad % tm == 0

    # Prefer full-K / full-N tiles (weight DMA'd once, accumulator skipped) while
    # keeping the weight block under ~2 MiB; otherwise tile with divisors.
    budget = 2 << 20
    tk = K if K * min(N, 512) * 4 <= budget else _pick(K, (512, 256, 128))
    tn = N if tk * N * 4 <= budget else _pick(N, (512, 256, 128))
    grid = (m_pad // tm, N // tn, K // tk)
    single_k = grid[2] == 1

    kernel = functools.partial(_layer_kernel, apply_affine=apply_affine,
                               apply_tanh=apply_tanh)
    scratch = [] if single_k else [pltpu.VMEM((tm, tn), jnp.float32)]
    return pl.pallas_call(
        kernel,
        out_shape=jax.ShapeDtypeStruct((m_pad, N), x.dtype),
        grid_spec=pltpu.PrefetchScalarGridSpec(
            num_scalar_prefetch=0,
            grid=grid,
            in_specs=[
                pl.BlockSpec(memory_space=pltpu.MemorySpace.SMEM),  # gain  (1,)
                pl.BlockSpec(memory_space=pltpu.MemorySpace.SMEM),  # shift (1,)
                pl.BlockSpec((tm, tk), lambda i, j, k: (i, k)),
                pl.BlockSpec((tk, tn), lambda i, j, k: (k, j)),
                pl.BlockSpec((1, tn), lambda i, j, k: (0, j)),
            ],
            out_specs=pl.BlockSpec((tm, tn), lambda i, j, k: (i, j)),
            scratch_shapes=scratch,
        ),
        compiler_params=pltpu.CompilerParams(
            dimension_semantics=("parallel", "parallel", "arbitrary")),
    )(gain, shift, x, w, b.reshape(1, N))


# ----------------------------------------------------------------------------
# Forward + params + reference
# ----------------------------------------------------------------------------
def mlp_forward(x, layers, affines):
    """Pallas forward: Linear -> [Affine -> Linear -> Tanh] x N -> Linear."""
    M, k0 = x.shape
    n_layer = len(affines)
    hidden = layers[0][0].shape[1]
    out_dim = layers[-1][0].shape[1]

    # Lane-dense final output: pad last layer's W/b columns to a multiple of 128,
    # slice back outside the kernel.
    out_pad = _round_up(max(out_dim, 128), 128)
    w_last, b_last = layers[-1]
    if out_pad != out_dim:
        w_last = jnp.pad(w_last, ((0, 0), (0, out_pad - out_dim)))
        b_last = jnp.pad(b_last, (0, out_pad - out_dim))
    mats = [layers[0]] + [layers[1 + n] for n in range(n_layer)] + [(w_last, b_last)]

    # M tiling: 256-row tiles when large (MXU-friendly, >=2 blocks for v7x's two
    # TensorCores); small batches collapse to one sublane-aligned block.
    if M > 256:
        tm = 256
        m_pad = _round_up(M, tm)
    else:
        m_pad = _round_up(M, 8)
        tm = m_pad
    if m_pad != M:
        x = jnp.pad(x, ((0, m_pad - M), (0, 0)))

    if n_layer:
        gains = jnp.concatenate([g.reshape(1) for g, _ in affines]).astype(jnp.float32)
        shifts = jnp.concatenate([s.reshape(1) for _, s in affines]).astype(jnp.float32)
    else:
        gains = jnp.ones((1,), jnp.float32)
        shifts = jnp.zeros((1,), jnp.float32)

    # Whole-MLP fusion when weights (x2 for buffering) + activation tiles stay well
    # under every generation's default scoped VMEM (v5e: 16 MiB).
    wb_bytes = sum(w.size * w.dtype.itemsize + b.size * b.dtype.itemsize
                   for w, b in mats)
    act_bytes = tm * max(k0, hidden, out_pad) * 4
    if 2 * wb_bytes + 4 * act_bytes <= 6 * 1024 * 1024:
        y = _mlp_fused_call(x, mats, gains, shifts, tm=tm, n_layer=n_layer)
    else:
        # Fallback: one fused (affine+matmul+bias+tanh) kernel per layer.
        one = jnp.ones((1,), jnp.float32)
        zero = jnp.zeros((1,), jnp.float32)
        h = _fused_affine_linear(x, mats[0][0], mats[0][1], one, zero,
                                 apply_affine=False, apply_tanh=False, tm=tm)
        for n in range(n_layer):
            g, s = affines[n]
            h = _fused_affine_linear(h, mats[1 + n][0], mats[1 + n][1],
                                     g.astype(jnp.float32), s.astype(jnp.float32),
                                     apply_affine=True, apply_tanh=True, tm=tm)
        y = _fused_affine_linear(h, mats[-1][0], mats[-1][1], one, zero,
                                 apply_affine=False, apply_tanh=False, tm=tm)

    return y[:M, :out_dim]


def init_mlp_params(key, input_dim, output_dim, int_dim, n_layer,
                    dtype=jnp.float32):
    """Mirror of the PyTorch MLP: hidden = int_dim*128, Linear weights with
    U(-1/sqrt(fan_in), 1/sqrt(fan_in)) init, Affine params = (ones, zeros)."""
    hidden = int_dim * 128
    dims = [(input_dim, hidden)] + [(hidden, hidden)] * n_layer \
        + [(hidden, output_dim)]
    keys = jax.random.split(key, len(dims))
    layers = []
    for kk, (din, dout) in zip(keys, dims):
        bound = 1.0 / (din ** 0.5)
        wkey, bkey = jax.random.split(kk)
        w = jax.random.uniform(wkey, (din, dout), dtype, -bound, bound)
        bb = jax.random.uniform(bkey, (dout,), dtype, -bound, bound)
        layers.append((w, bb))
    affines = [(jnp.ones((1,), dtype), jnp.zeros((1,), dtype))
               for _ in range(n_layer)]
    return layers, affines


def mlp_ref(x, layers, affines):
    """Pure-JAX reference."""
    w, bb = layers[0]
    h = x @ w + bb
    for n, (g, s) in enumerate(affines):
        w, bb = layers[1 + n]
        h = jnp.tanh((h * g[0] + s[0]) @ w + bb)
    w, bb = layers[-1]
    return h @ w + bb


if __name__ == "__main__":
    key = jax.random.PRNGKey(0)
    batch, input_dim, output_dim, int_dim, n_layer = 8, 16, 8, 1, 2

    kx, kp, ka = jax.random.split(key, 3)
    x = jax.random.normal(kx, (batch, input_dim), dtype=jnp.float32)
    layers, affines = init_mlp_params(kp, input_dim, output_dim, int_dim,
                                      n_layer)
    # Use non-trivial gain/shift values so the Affine path is actually exercised
    # (the module initialises them to ones/zeros).
    akeys = jax.random.split(ka, n_layer)
    affines = [(1.0 + 0.1 * jax.random.normal(k, (1,), jnp.float32),
                0.1 * jax.random.normal(k, (1,), jnp.float32)) for k in akeys]

    y = mlp_forward(x, layers, affines)
    jax.block_until_ready(y)

    y_ref = mlp_ref(x, layers, affines)
    assert y.shape == (batch, output_dim) and y.dtype == x.dtype
    err = float(jnp.max(jnp.abs(y - y_ref)))
    assert jnp.allclose(y, y_ref, atol=2e-3, rtol=2e-3), f"max abs err {err}"

    print("KERNEL_OK")
</pallas_src>

<mosaic_0001>
module attributes {stable_mosaic.version = 11 : i64} {
  func.func @_mlp_fused_kernel(%arg0: i32, %arg1: memref<2xf32, #tpu.memory_space<smem>>, %arg2: memref<2xf32, #tpu.memory_space<smem>>, %arg3: memref<8x16xf32, #tpu.memory_space<vmem>>, %arg4: memref<16x128xf32, #tpu.memory_space<vmem>>, %arg5: memref<1x128xf32, #tpu.memory_space<vmem>>, %arg6: memref<128x128xf32, #tpu.memory_space<vmem>>, %arg7: memref<1x128xf32, #tpu.memory_space<vmem>>, %arg8: memref<128x128xf32, #tpu.memory_space<vmem>>, %arg9: memref<1x128xf32, #tpu.memory_space<vmem>>, %arg10: memref<128x128xf32, #tpu.memory_space<vmem>>, %arg11: memref<1x128xf32, #tpu.memory_space<vmem>>, %arg12: memref<8x128xf32, #tpu.memory_space<vmem>>) attributes {dimension_semantics = [#tpu.dimension_semantics<parallel>], iteration_bounds = array<i64: 1>, scalar_prefetch = 0 : i64, scratch_operands = 0 : i64, tpu.core_type = #tpu.core_type<tc>, window_params = [{transform_indices = @transform_0, window_bounds = array<i64: 2>}, {transform_indices = @transform_1, window_bounds = array<i64: 2>}, {transform_indices = @transform_2, window_bounds = array<i64: 8, 16>}, {pipeline_mode = #tpu.pipeline_mode<synchronous>, transform_indices = @transform_3, window_bounds = array<i64: 16, 128>}, {pipeline_mode = #tpu.pipeline_mode<synchronous>, transform_indices = @transform_4, window_bounds = array<i64: 1, 128>}, {pipeline_mode = #tpu.pipeline_mode<synchronous>, transform_indices = @transform_5, window_bounds = array<i64: 128, 128>}, {pipeline_mode = #tpu.pipeline_mode<synchronous>, transform_indices = @transform_6, window_bounds = array<i64: 1, 128>}, {pipeline_mode = #tpu.pipeline_mode<synchronous>, transform_indices = @transform_7, window_bounds = array<i64: 128, 128>}, {pipeline_mode = #tpu.pipeline_mode<synchronous>, transform_indices = @transform_8, window_bounds = array<i64: 1, 128>}, {pipeline_mode = #tpu.pipeline_mode<synchronous>, transform_indices = @transform_9, window_bounds = array<i64: 128, 128>}, {pipeline_mode = #tpu.pipeline_mode<synchronous>, transform_indices = @transform_10, window_bounds = array<i64: 1, 128>}, {transform_indices = @transform_11, window_bounds = array<i64: 8, 128>}]} {
    %c0 = arith.constant 0 : index
    %c0_0 = arith.constant 0 : index
    %0 = vector.load %arg3[%c0, %c0_0] : memref<8x16xf32, #tpu.memory_space<vmem>>, vector<8x16xf32>
    %c0_1 = arith.constant 0 : index
    %c0_2 = arith.constant 0 : index
    %1 = vector.load %arg4[%c0_1, %c0_2] : memref<16x128xf32, #tpu.memory_space<vmem>>, vector<16x128xf32>
    %cst = arith.constant dense<0.000000e+00> : vector<8x128xf32>
    %2 = tpu.matmul %0, %1, %cst {dimension_numbers = #tpu.dot_dimension_numbers<[1], [0], [0], [1], [0, 0, 1, 1], [], []>} : vector<8x16xf32>, vector<16x128xf32>, vector<8x128xf32> -> vector<8x128xf32>
    %c0_3 = arith.constant 0 : index
    %c0_4 = arith.constant 0 : index
    %3 = vector.load %arg5[%c0_3, %c0_4] : memref<1x128xf32, #tpu.memory_space<vmem>>, vector<1x128xf32>
    %4 = vector.broadcast %3 : vector<1x128xf32> to vector<8x128xf32>
    %5 = arith.addf %2, %4 : vector<8x128xf32>
    %c0_5 = arith.constant 0 : index
    %6 = memref.load %arg1[%c0_5] : memref<2xf32, #tpu.memory_space<smem>>
    %7 = vector.broadcast %6 : f32 to vector<8x128xf32>
    %8 = arith.mulf %5, %7 : vector<8x128xf32>
    %c0_6 = arith.constant 0 : index
    %9 = memref.load %arg2[%c0_6] : memref<2xf32, #tpu.memory_space<smem>>
    %10 = vector.broadcast %9 : f32 to vector<8x128xf32>
    %11 = arith.addf %8, %10 : vector<8x128xf32>
    %c0_7 = arith.constant 0 : index
    %c0_8 = arith.constant 0 : index
    %12 = vector.load %arg6[%c0_7, %c0_8] : memref<128x128xf32, #tpu.memory_space<vmem>>, vector<128x128xf32>
    %cst_9 = arith.constant dense<0.000000e+00> : vector<8x128xf32>
    %13 = tpu.matmul %11, %12, %cst_9 {dimension_numbers = #tpu.dot_dimension_numbers<[1], [0], [0], [1], [0, 0, 1, 1], [], []>} : vector<8x128xf32>, vector<128x128xf32>, vector<8x128xf32> -> vector<8x128xf32>
    %c0_10 = arith.constant 0 : index
    %c0_11 = arith.constant 0 : index
    %14 = vector.load %arg7[%c0_10, %c0_11] : memref<1x128xf32, #tpu.memory_space<vmem>>, vector<1x128xf32>
    %15 = vector.broadcast %14 : vector<1x128xf32> to vector<8x128xf32>
    %16 = arith.addf %13, %15 : vector<8x128xf32>
    %17 = math.tanh %16 : vector<8x128xf32>
    %c1 = arith.constant 1 : index
    %18 = memref.load %arg1[%c1] : memref<2xf32, #tpu.memory_space<smem>>
    %19 = vector.broadcast %18 : f32 to vector<8x128xf32>
    %20 = arith.mulf %17, %19 : vector<8x128xf32>
    %c1_12 = arith.constant 1 : index
    %21 = memref.load %arg2[%c1_12] : memref<2xf32, #tpu.memory_space<smem>>
    %22 = vector.broadcast %21 : f32 to vector<8x128xf32>
    %23 = arith.addf %20, %22 : vector<8x128xf32>
    %c0_13 = arith.constant 0 : index
    %c0_14 = arith.constant 0 : index
    %24 = vector.load %arg8[%c0_13, %c0_14] : memref<128x128xf32, #tpu.memory_space<vmem>>, vector<128x128xf32>
    %cst_15 = arith.constant dense<0.000000e+00> : vector<8x128xf32>
    %25 = tpu.matmul %23, %24, %cst_15 {dimension_numbers = #tpu.dot_dimension_numbers<[1], [0], [0], [1], [0, 0, 1, 1], [], []>} : vector<8x128xf32>, vector<128x128xf32>, vector<8x128xf32> -> vector<8x128xf32>
    %c0_16 = arith.constant 0 : index
    %c0_17 = arith.constant 0 : index
    %26 = vector.load %arg9[%c0_16, %c0_17] : memref<1x128xf32, #tpu.memory_space<vmem>>, vector<1x128xf32>
    %27 = vector.broadcast %26 : vector<1x128xf32> to vector<8x128xf32>
    %28 = arith.addf %25, %27 : vector<8x128xf32>
    %29 = math.tanh %28 : vector<8x128xf32>
    %c0_18 = arith.constant 0 : index
    %c0_19 = arith.constant 0 : index
    %30 = vector.load %arg10[%c0_18, %c0_19] : memref<128x128xf32, #tpu.memory_space<vmem>>, vector<128x128xf32>
    %cst_20 = arith.constant dense<0.000000e+00> : vector<8x128xf32>
    %31 = tpu.matmul %29, %30, %cst_20 {dimension_numbers = #tpu.dot_dimension_numbers<[1], [0], [0], [1], [0, 0, 1, 1], [], []>} : vector<8x128xf32>, vector<128x128xf32>, vector<8x128xf32> -> vector<8x128xf32>
    %c0_21 = arith.constant 0 : index
    %c0_22 = arith.constant 0 : index
    %32 = vector.load %arg11[%c0_21, %c0_22] : memref<1x128xf32, #tpu.memory_space<vmem>>, vector<1x128xf32>
    %33 = vector.broadcast %32 : vector<1x128xf32> to vector<8x128xf32>
    %34 = arith.addf %31, %33 : vector<8x128xf32>
    %c0_23 = arith.constant 0 : index
    %c0_24 = arith.constant 0 : index
    %35 = vector.load %arg12[%c0_23, %c0_24] : memref<8x128xf32, #tpu.memory_space<vmem>>, vector<8x128xf32>
    tpu.vector_store %arg12[%c0_23, %c0_24], %34 {strides = array<i32>} : memref<8x128xf32, #tpu.memory_space<vmem>>, vector<8x128xf32>,
    return
  }
  func.func @transform_0(%arg0: i32) -> i32 {
    %c0_i32 = arith.constant 0 : i32
    %c0_i32_0 = arith.constant 0 : i32
    return %c0_i32 : i32
  }
  func.func @transform_1(%arg0: i32) -> i32 {
    %c0_i32 = arith.constant 0 : i32
    %c0_i32_0 = arith.constant 0 : i32
    return %c0_i32 : i32
  }
  func.func @transform_2(%arg0: i32) -> (i32, i32) {
    %c0_i32 = arith.constant 0 : i32
    %c0_i32_0 = arith.constant 0 : i32
    return %arg0, %c0_i32 : i32, i32
  }
  func.func @transform_3(%arg0: i32) -> (i32, i32) {
    %c0_i32 = arith.constant 0 : i32
    %c0_i32_0 = arith.constant 0 : i32
    %c0_i32_1 = arith.constant 0 : i32
    return %c0_i32, %c0_i32_0 : i32, i32
  }
  func.func @transform_4(%arg0: i32) -> (i32, i32) {
    %c0_i32 = arith.constant 0 : i32
    %c0_i32_0 = arith.constant 0 : i32
    %c0_i32_1 = arith.constant 0 : i32
    return %c0_i32, %c0_i32_0 : i32, i32
  }
  func.func @transform_5(%arg0: i32) -> (i32, i32) {
    %c0_i32 = arith.constant 0 : i32
    %c0_i32_0 = arith.constant 0 : i32
    %c0_i32_1 = arith.constant 0 : i32
    return %c0_i32, %c0_i32_0 : i32, i32
  }
  func.func @transform_6(%arg0: i32) -> (i32, i32) {
    %c0_i32 = arith.constant 0 : i32
    %c0_i32_0 = arith.constant 0 : i32
    %c0_i32_1 = arith.constant 0 : i32
    return %c0_i32, %c0_i32_0 : i32, i32
  }
  func.func @transform_7(%arg0: i32) -> (i32, i32) {
    %c0_i32 = arith.constant 0 : i32
    %c0_i32_0 = arith.constant 0 : i32
    %c0_i32_1 = arith.constant 0 : i32
    return %c0_i32, %c0_i32_0 : i32, i32
  }
  func.func @transform_8(%arg0: i32) -> (i32, i32) {
    %c0_i32 = arith.constant 0 : i32
    %c0_i32_0 = arith.constant 0 : i32
    %c0_i32_1 = arith.constant 0 : i32
    return %c0_i32, %c0_i32_0 : i32, i32
  }
  func.func @transform_9(%arg0: i32) -> (i32, i32) {
    %c0_i32 = arith.constant 0 : i32
    %c0_i32_0 = arith.constant 0 : i32
    %c0_i32_1 = arith.constant 0 : i32
    return %c0_i32, %c0_i32_0 : i32, i32
  }
  func.func @transform_10(%arg0: i32) -> (i32, i32) {
    %c0_i32 = arith.constant 0 : i32
    %c0_i32_0 = arith.constant 0 : i32
    %c0_i32_1 = arith.constant 0 : i32
    return %c0_i32, %c0_i32_0 : i32, i32
  }
  func.func @transform_11(%arg0: i32) -> (i32, i32) {
    %c0_i32 = arith.constant 0 : i32
    %c0_i32_0 = arith.constant 0 : i32
    return %arg0, %c0_i32 : i32, i32
  }
}

</mosaic_0001>

<bundles_post_ra>
// kernel: tpu_custom_call.1
= control target key start
LH: loop header
LB: loop body
LE: loop exit
PB: predicated region body
PF: predicated region fallthrough
CT: control target
= control target key end

     0   :  { %16 = vsyncpa [#allocation5], 0  ;;  %s646_s0 = inlined_call_operand.hbm [shape: f32[2], index: 0, kind: input, shape index: {}]   ;;  %s647_s1 = inlined_call_operand.hbm [shape: f32[2], index: 1, kind: input, shape index: {}]   ;;  %s648_s2 = inlined_call_operand.hbm [shape: f32[8,16], index: 2, kind: input, shape index: {}]   ;;  %s649_s3 = inlined_call_operand.hbm [shape: f32[16,128], index: 3, kind: input, shape index: {}]   ;;  %s650_s4 = inlined_call_operand.vmem [shape: f32[1,128], index: 4, kind: input, shape index: {}]   ;;  %s651_s5 = inlined_call_operand.hbm [shape: f32[128,128], index: 5, kind: input, shape index: {}]   ;;  %s652_s6 = inlined_call_operand.vmem [shape: f32[1,128], index: 6, kind: input, shape index: {}]   ;;  %s653_s7 = inlined_call_operand.hbm [shape: f32[128,128], index: 7, kind: input, shape index: {}]   ;;  %s654_s8 = inlined_call_operand.vmem [shape: f32[1,128], index: 8, kind: input, shape index: {}]   ;;  %s655_s9 = inlined_call_operand.hbm [shape: f32[128,128], index: 9, kind: input, shape index: {}]   ;;  %s656_s10 = inlined_call_operand.vmem [shape: f32[1,128], index: 10, kind: input, shape index: {}]   ;;  %s657_s11 = inlined_call_operand.hbm [shape: f32[8,128], index: 11, kind: output, shape index: {}]  }
   0x1   :  { %17 = vsyncpa [#allocation7], 0 }
   0x2   :  { %18 = vsyncpa [#allocation3], 0 }
   0x3   :  { %19 = vsyncpa [#allocation10], 0 }
   0x4   :  { %20 = vsyncpa [#allocation13], 0  ;;  %s55_s19 = sshll.u32 %s649_s3, 4  ;;  %s56_s19 = int_to_ptr.hbm [resolvable:$true] %s55_s19 }
   0x5   :  { %21 = vsyncpa [#allocation4], 0  ;;  %s528_s20 = smov [#allocation9]   ;;  %s85_s24 = sshll.u32 %s653_s7, 4  ;;  %s86_s24 = int_to_ptr.hbm [resolvable:$true] %s85_s24 }
   0x6   :  { %s57_s21 = sshll.u32 %s528_s20, 4  ;;  %s529_s25 = smov 128   ;;  %s58_s21 = int_to_ptr.vmem [resolvable:$true] %s57_s21 }
   0x7   :  { %s530_s26 = smov 8   ;;  %s531_s27 = smov [#allocation12]  }
   0x8   :  { %63 = dma.hbm_to_vmem [thread:$0]  %s56_s19, 256, %s58_s21, [#allocation10], %s529_s25, %s529_s25, %s530_s26  }
   0x9   :  { %s87_s28 = sshll.u32 %s531_s27, 4  ;;  %s27_s30 = sshll.u32 %s646_s0, 4  ;;  %s88_s28 = int_to_ptr.vmem [resolvable:$true] %s87_s28  ;;  %s28_s30 = int_to_ptr.hbm [resolvable:$true] %s27_s30 }
   0xa   :  { %93 = dma.hbm_to_vmem [thread:$0]  %s86_s24, 2048, %s88_s28, [#allocation13], %s529_s25, %s529_s25, %s530_s26  }
   0xb   :  { %s36_s13 = sshll.u32 %s647_s1, 4  ;;  %s532_s14 = smov [#allocation2]   ;;  %s37_s13 = int_to_ptr.hbm [resolvable:$true] %s36_s13 }
   0xc   :  { %30 = dma.hbm_to_smem %s28_s30, 16, %s532_s14, [#allocation5]  }
   0xd   :  { %s533_s15 = smov [#allocation6]   ;;  %s45_s18 = sshll.u32 %s648_s2, 4  ;;  %s46_s18 = int_to_ptr.hbm [resolvable:$true] %s45_s18 }
   0xe   :  { %39 = dma.hbm_to_smem %s37_s13, 16, %s533_s15, [#allocation7]  }
   0xf   :  { %s534_s0 = smov [#allocation8]   ;;  %s70_s22 = sshll.u32 %s651_s5, 4  ;;  %s71_s22 = int_to_ptr.hbm [resolvable:$true] %s70_s22 }
  0x10   :  { %s47_s19 = sshll.u32 %s534_s0, 4  ;;  %s535_s1 = smov [#allocation11]   ;;  %s48_s19 = int_to_ptr.vmem [resolvable:$true] %s47_s19 }
  0x11   :  { %50 = dma.hbm_to_vmem [thread:$0]  %s46_s18, 128, %s48_s19, [#allocation3]  }
  0x12   :  { %s72_s23 = sshll.u32 %s535_s1, 4  ;;  %s100_s28 = sshll.u32 %s655_s9, 4  ;;  %s73_s23 = int_to_ptr.vmem [resolvable:$true] %s72_s23  ;;  %s101_s28 = int_to_ptr.hbm [resolvable:$true] %s100_s28 }
  0x13   :  { %78 = dma.hbm_to_vmem [thread:$0]  %s71_s22, 2048, %s73_s23, [#allocation10], %s529_s25, %s529_s25, %s530_s26  }
  0x14   :  { %s536_s2 = smov [#allocation14]  }
  0x15   :  { %s102_s29 = sshll.u32 %s536_s2, 4  ;;  %s103_s29 = int_to_ptr.vmem [resolvable:$true] %s102_s29 }
  0x16   :  { %108 = dma.hbm_to_vmem [thread:$0]  %s101_s28, 2048, %s103_s29, [#allocation13], %s529_s25, %s529_s25, %s530_s26  }
  0x17   :  { %516 = dma.done.wait [#allocation5], 16  }
  0x18   :  { %517 = vsyncadd [#allocation5], 4294967280 }
  0x19   :  { %518 = dma.done.wait [#allocation7], 16  }
  0x1a   :  { %519 = vsyncadd [#allocation7], 4294967280 }
  0x1b   :  { %520 = dma.done.wait [#allocation3], 128  }
  0x1c   :  { %521 = vsyncadd [#allocation3], 4294967168 }
  0x1d   :  { %522 = dma.done.wait [#allocation10], 2304  }
  0x1e   :  { %523 = vsyncadd [#allocation10], 4294964992 }
  0x1f   :  { %524 = dma.done.wait [#allocation13], 4096  }
  0x20   :  { %525 = vsyncadd [#allocation13], 4294963200 }
  0x21   :  { %139 = sfence }
  0x22   :  { %v142_v0 = vld [vmem:[#allocation9 + $0x8] sm:$0xff]  ;;  %v141_v1 = vld [vmem:[#allocation9] sm:$0xff]  ;;  %v140_v2 = vld [vmem:[#allocation8] sm:$0xff]  ;;  %vm147_vm0 = vcmask 130048   ;;  %s171_s5 = sld [smem:[#allocation2]]  ;;  %s537_s15 = smov [#allocation15]  }
  0x23   :  { %165 = vmatpush.msra.mxu0 %v142_v0  ;;  %v192_v3 = vld [vmem:[#allocation11 + $0x78] sm:$0xff]  ;;  %v191_v4 = vld [vmem:[#allocation11 + $0x70] sm:$0xff]  ;;  %v190_v5 = vld [vmem:[#allocation11 + $0x68] sm:$0xff]  ;;  %s174_s9 = sld [smem:[#allocation6]]  ;;  %s311_s16 = sshll.u32 %s537_s15, 4  ;;  %s312_s16 = int_to_ptr.vmem [resolvable:$true] %s311_s16 }
  0x24   :  { %197 = vmatpush.msra.mxu1 %v192_v3  ;;  %v189_v6 = vld [vmem:[#allocation11 + $0x60] sm:$0xff]  ;;  %v188_v7 = vld [vmem:[#allocation11 + $0x58] sm:$0xff]  ;;  %v187_v8 = vld [vmem:[#allocation11 + $0x50] sm:$0xff]  ;;  %s328_s30 = sld [smem:[#allocation2 + $0x1]]  ;;  %s313_s0 = sshll.u32 %s657_s11, 4  ;;  %s314_s0 = int_to_ptr.hbm [resolvable:$true] %s313_s0 }
  0x25   :  { %166 = vmatpush.msra.mxu0 %v141_v1  ;;  %v186_v9 = vld [vmem:[#allocation11 + $0x48] sm:$0xff]  ;;  %v185_v10 = vld [vmem:[#allocation11 + $0x40] sm:$0xff]  ;;  %v184_v11 = vld [vmem:[#allocation11 + $0x38] sm:$0xff]  ;;  %s329_s7 = sld [smem:[#allocation6 + $0x1]] }
  0x26   :  { %327 = vmatmul.msk.f32.vlgmr.msra.gmra.mxu0 %vm147_vm0, %v140_v2  ;;  %198 = vmatpush.msra.mxu1 %v191_v4  ;;  %v183_v12 = vld [vmem:[#allocation11 + $0x30] sm:$0xff]  ;;  %v182_v13 = vld [vmem:[#allocation11 + $0x28] sm:$0xff]  ;;  %v181_v14 = vld [vmem:[#allocation11 + $0x20] sm:$0xff] }
  0x27   :  { %v180_v15 = vld [vmem:[#allocation11 + $0x18] sm:$0xff]  ;;  %v179_v16 = vld [vmem:[#allocation11 + $0x10] sm:$0xff]  ;;  %v178_v17 = vld [vmem:[#allocation11 + $0x8] sm:$0xff] }
  0x28   :  { %199 = vmatpush.msra.mxu1 %v190_v5  ;;  %v177_v18 = vld [vmem:[#allocation11] sm:$0xff]  ;;  %v239_v19 = vld [vmem:[#allocation12 + $0x78] sm:$0xff]  ;;  %v238_v20 = vld [vmem:[#allocation12 + $0x70] sm:$0xff]  ;;  %v172_v30 = vstv %s171_s5 }
  0x29   :  { %244 = vmatpush.msra.mxu2 %v239_v19  ;;  %v237_v21 = vld [vmem:[#allocation12 + $0x68] sm:$0xff]  ;;  %v236_v22 = vld [vmem:[#allocation12 + $0x60] sm:$0xff]  ;;  %v235_v23 = vld [vmem:[#allocation12 + $0x58] sm:$0xff]  ;;  %v175_v32 = vstv %s174_s9 }
  0x2a   :  { %200 = vmatpush.msra.mxu1 %v189_v6  ;;  %v234_v24 = vld [vmem:[#allocation12 + $0x50] sm:$0xff]  ;;  %v233_v25 = vld [vmem:[#allocation12 + $0x48] sm:$0xff]  ;;  %v232_v26 = vld [vmem:[#allocation12 + $0x40] sm:$0xff]  ;;  %v219_v56 = vstv %s328_s30 }
  0x2b   :  { %245 = vmatpush.msra.mxu2 %v238_v20  ;;  %v231_v27 = vld [vmem:[#allocation12 + $0x38] sm:$0xff]  ;;  %v340_v28 = vld [vmem:[%s650_s4] ss:$0 sm:$0xff]  ;;  %v230_v35 = vld [vmem:[#allocation12 + $0x30] sm:$0xff]  ;;  %v222_v58 = vstv %s329_s7 }
  0x2c   :  { %201 = vmatpush.msra.mxu1 %v188_v7  ;;  %v229_v36 = vld [vmem:[#allocation12 + $0x28] sm:$0xff]  ;;  %v228_v37 = vld [vmem:[#allocation12 + $0x20] sm:$0xff]  ;;  %v227_v38 = vld [vmem:[#allocation12 + $0x18] sm:$0xff] }
  0x2d   :  { %246 = vmatpush.msra.mxu2 %v237_v21  ;;  %v226_v39 = vld [vmem:[#allocation12 + $0x10] sm:$0xff]  ;;  %v225_v40 = vld [vmem:[#allocation12 + $0x8] sm:$0xff]  ;;  %v224_v41 = vld [vmem:[#allocation12] sm:$0xff] }
  0x2e   :  { %202 = vmatpush.msra.mxu1 %v187_v8  ;;  %v280_v42 = vld [vmem:[#allocation14 + $0x78] sm:$0xff]  ;;  %v279_v43 = vld [vmem:[#allocation14 + $0x70] sm:$0xff]  ;;  %v278_v44 = vld [vmem:[#allocation14 + $0x68] sm:$0xff] }
  0x2f   :  { %247 = vmatpush.msra.mxu2 %v236_v22  ;;  %285 = vmatpush.msra.mxu3 %v280_v42  ;;  %v277_v45 = vld [vmem:[#allocation14 + $0x60] sm:$0xff]  ;;  %v276_v46 = vld [vmem:[#allocation14 + $0x58] sm:$0xff]  ;;  %v275_v47 = vld [vmem:[#allocation14 + $0x50] sm:$0xff] }
  0x30   :  { %203 = vmatpush.msra.mxu1 %v186_v9  ;;  %v274_v48 = vld [vmem:[#allocation14 + $0x48] sm:$0xff]  ;;  %v273_v49 = vld [vmem:[#allocation14 + $0x40] sm:$0xff]  ;;  %v272_v50 = vld [vmem:[#allocation14 + $0x38] sm:$0xff] }
  0x31   :  { %248 = vmatpush.msra.mxu2 %v235_v23  ;;  %286 = vmatpush.msra.mxu3 %v279_v43  ;;  %v341_v51 = vld [vmem:[%s652_s6] ss:$0 sm:$0xff]  ;;  %v271_v52 = vld [vmem:[#allocation14 + $0x30] sm:$0xff]  ;;  %v269_v61 = vld [vmem:[#allocation14 + $0x20] sm:$0xff] }
  0x32   :  { %204 = vmatpush.msra.mxu1 %v185_v10  ;;  %v270_v54 = vld [vmem:[#allocation14 + $0x28] sm:$0xff]  ;;  %v268_v62 = vld [vmem:[#allocation14 + $0x18] sm:$0xff]  ;;  %v267_v63 = vld [vmem:[#allocation14 + $0x10] sm:$0xff] }
  0x33   :  { %249 = vmatpush.msra.mxu2 %v234_v24  ;;  %287 = vmatpush.msra.mxu3 %v278_v44  ;;  %v266_v0 = vld [vmem:[#allocation14 + $0x8] sm:$0xff]  ;;  %v265_v1 = vld [vmem:[#allocation14] sm:$0xff] }
  0x34   :  { %205 = vmatpush.msra.mxu1 %v184_v11  ;;  %v342_v2 = vld [vmem:[%s654_s8] ss:$0 sm:$0xff] }
  0x35   :  { %250 = vmatpush.msra.mxu2 %v233_v25  ;;  %288 = vmatpush.msra.mxu3 %v277_v45  ;;  %v343_v6 = vld [vmem:[%s656_s10] ss:$0 sm:$0xff] }
  0x36   :  { %206 = vmatpush.msra.mxu1 %v183_v12 }
  0x37   :  { %251 = vmatpush.msra.mxu2 %v232_v26  ;;  %289 = vmatpush.msra.mxu3 %v276_v46 }
  0x38   :  { %207 = vmatpush.msra.mxu1 %v182_v13 }
  0x39   :  { %252 = vmatpush.msra.mxu2 %v231_v27  ;;  %290 = vmatpush.msra.mxu3 %v275_v47 }
  0x3a   :  { %208 = vmatpush.msra.mxu1 %v181_v14 }
  0x3b   :  { %253 = vmatpush.msra.mxu2 %v230_v35  ;;  %291 = vmatpush.msra.mxu3 %v274_v48 }
  0x3c   :  { %209 = vmatpush.msra.mxu1 %v180_v15 }
  0x3d   :  { %254 = vmatpush.msra.mxu2 %v229_v36  ;;  %292 = vmatpush.msra.mxu3 %v273_v49 }
  0x3e   :  { %210 = vmatpush.msra.mxu1 %v179_v16 }
  0x3f   :  { %255 = vmatpush.msra.mxu2 %v228_v37  ;;  %293 = vmatpush.msra.mxu3 %v272_v50 }
  0x40   :  { %211 = vmatpush.msra.mxu1 %v178_v17 }
  0x41   :  { %256 = vmatpush.msra.mxu2 %v227_v38  ;;  %294 = vmatpush.msra.mxu3 %v271_v52 }
  0x42   :  { %212 = vmatpush.msra.mxu1 %v177_v18 }
  0x43   :  { %257 = vmatpush.msra.mxu2 %v226_v39  ;;  %295 = vmatpush.msra.mxu3 %v270_v54 }
  0x45   :  { %258 = vmatpush.msra.mxu2 %v225_v40  ;;  %296 = vmatpush.msra.mxu3 %v269_v61 }
  0x47   :  { %259 = vmatpush.msra.mxu2 %v224_v41  ;;  %297 = vmatpush.msra.mxu3 %v268_v62 }
  0x49   :  { %298 = vmatpush.msra.mxu3 %v267_v63 }
  0x4b   :  { %299 = vmatpush.msra.mxu3 %v266_v0 }
  0x4d   :  { %300 = vmatpush.msra.mxu3 %v265_v1 }
  0xa3   :  { %v168_v29 = vpop.f32.mrf.mxu0 }
  0xa4   :  { %v169_v31 = vadd.f32 %v340_v28, %v168_v29 }
  0xa6   :  { %v173_v33 = vmul.f32 %v172_v30, %v169_v31 }
  0xa8   :  { %v176_v34 = vadd.f32 %v175_v32, %v173_v33 }
  0xaa   :  { %213 = vmatmul.f32.vlgmr.msra.gmra.mxu1 %v176_v34 }
 0x127   :  { %v214_v53 = vpop.f32.mrf.mxu1 }
 0x128   :  { %v215_v55 = vadd.f32 %v341_v51, %v214_v53 }
 0x12a   :  { %344 = vtanh.f32 %v215_v55 }
 0x130   :  { %v345_v57 = vpop.eup %344 }
 0x131   :  { %v220_v59 = vmul.f32 %v345_v57, %v219_v56 }
 0x133   :  { %v223_v60 = vadd.f32 %v222_v58, %v220_v59 }
 0x135   :  { %260 = vmatmul.f32.vlgmr.msra.gmra.mxu2 %v223_v60 }
 0x1b8   :  { %v261_v3 = vpop.f32.mrf.mxu2 }
 0x1b9   :  { %v262_v4 = vadd.f32 %v342_v2, %v261_v3 }
 0x1bb   :  { %346 = vtanh.f32 %v262_v4 }
 0x1c1   :  { %v347_v5 = vpop.eup %346 }
 0x1c2   :  { %301 = vmatmul.f32.vlgmr.msra.gmra.mxu3 %v347_v5 }
 0x245   :  { %v302_v7 = vpop.f32.mrf.mxu3 }
 0x246   :  { %v303_v8 = vadd.f32 %v343_v6, %v302_v7 }
 0x248   :  { %305 = vst [vmem:[#allocation15] sm:$0xff] %v303_v8 }
 0x249   :  { %316 = dma.vmem_to_hbm [thread:$0]  %s312_s16, 128, %s314_s0, [#allocation4]  }
 0x24a   :  { %526 = dma.done.wait [#allocation4], 128  }
 0x24b   :  { %527 = vsyncadd [#allocation4], 4294967168 }
 0x24c   :  { %321 = vsyncpa [#allocation3], 1 }
 0x24d   :  { %322 = vsyncpa [#allocation10], 1 }
 0x24e   :  { %323 = vsyncpa [#allocation13], 1 }
 0x24f   :  { %324 = vsyncpa [#allocation4], 1 }
 0x250   :  { %325 = vsyncpa [#allocation5], 1 }
 0x251   :  { %326 = vsyncpa [#allocation7], 1 }

</bundles_post_ra>
